<compile_context>
chip_gen: v6e
topology: v6e:2x2x1
jax: 0.10.0
libtpu: 0.0.40
codegen_flags: <defaults>
</compile_context>

<pallas_src>
import jax
import jax.numpy as jnp
from jax.experimental import pallas as pl
from jax.experimental.pallas import tpu as pltpu


def _make_kernel(eps: float):
    def kernel(f1_ref, f2_ref, out_ref):
        a = f1_ref[...].astype(jnp.float32)   # (bn, C, tile_s, 128)
        b = f2_ref[...].astype(jnp.float32)   # (bn, C, tile_s, 128)

        # Channel reduction over axis=1: pure VALU vreg adds (lane/sublane dense).
        dot = jnp.sum(a * b, axis=1)          # (bn, tile_s, 128)
        s1 = jnp.sum(a * a, axis=1)           # (bn, tile_s, 128)
        s2 = jnp.sum(b * b, axis=1)           # (bn, tile_s, 128)

        # cosine = dot / (||a||*||b|| + eps); sqrt(s1)*sqrt(s2) == sqrt(s1*s2).
        denom = jnp.sqrt(s1 * s2) + jnp.float32(eps)
        cosine = dot * pl.reciprocal(denom, approx=False)

        out_ref[...] = 1.0 - cosine           # per-element loss map (partials)

    return kernel


def _pick_tiles(N: int, C: int, n_rows: int, itemsize: int,
                max_block_bytes: int):
    """Pick (bn, tile_s): largest legal spatial tile fitting the VMEM budget,
    then grow the batch group bn (divisor of N) toward a ~2 MiB block floor.

    Legal tile_s: a multiple of 8 that divides n_rows, or n_rows itself
    (full-extent blocks are always layout-legal)."""

    def block_bytes(bn, ts):
        inp = 2 * 2 * bn * C * ts * 128 * itemsize   # 2 inputs x double buffer
        out = 2 * bn * ts * 128 * 4                  # f32 partials x double buffer
        return inp + out

    cands = {n_rows}
    d = 8 * (n_rows // 8)
    while d > 0:
        if n_rows % d == 0:
            cands.add(d)
        d -= 8
    cands = sorted(cands, reverse=True)

    tile_s = None
    for ts in cands:
        if block_bytes(1, ts) <= max_block_bytes:
            tile_s = ts
            break
    if tile_s is None:
        tile_s = min(cands)   # even the smallest legal tile overshoots; accept it

    target = min(max_block_bytes, 2 << 20)
    bn = 1
    for cand in range(1, N + 1):
        if N % cand == 0 and block_bytes(cand, tile_s) <= max_block_bytes:
            bn = cand
            if block_bytes(cand, tile_s) >= target:
                break
    return bn, tile_s


def cosine_similarity_loss(f1, f2, eps: float = 1e-05,
                           max_vmem_block_bytes: int = 8 << 20,
                           vmem_limit_bytes: int = 32 << 20):
    """f1, f2: (N, C, H, W) -> scalar loss (float32).

    Defaults keep double-buffered blocks + scoped VMEM comfortably inside
    v7x's 64 MiB as well as v5e/v6e's 128 MiB.
    """
    assert f1.shape == f2.shape and f1.ndim == 4
    N, C, H, W = f1.shape
    HW = H * W
    M = N * HW

    # Contiguous (free) reshape -- no HBM transpose pass.
    f1_r = f1.reshape(N, C, HW)
    f2_r = f2.reshape(N, C, HW)

    HW_pad = ((HW + 127) // 128) * 128
    if HW_pad != HW:
        # TODO(synk): this zero-pad is one extra HBM copy pass for
        # non-128-multiple H*W; a masked last tile inside the kernel would
        # avoid it.  Padded lanes are sliced off before the final sum.
        pad = HW_pad - HW
        f1_r = jnp.pad(f1_r, ((0, 0), (0, 0), (0, pad)))
        f2_r = jnp.pad(f2_r, ((0, 0), (0, 0), (0, pad)))

    n_rows = HW_pad // 128
    # Free reshape: split the last (contiguous) dim into (sublane rows, lanes).
    f1_r = f1_r.reshape(N, C, n_rows, 128)
    f2_r = f2_r.reshape(N, C, n_rows, 128)

    itemsize = jnp.dtype(f1.dtype).itemsize
    bn, tile_s = _pick_tiles(N, C, n_rows, itemsize, max_vmem_block_bytes)
    assert N % bn == 0 and n_rows % tile_s == 0
    grid = (N // bn, n_rows // tile_s)

    cost = pl.CostEstimate(
        flops=6 * N * C * HW_pad,
        transcendentals=2 * N * HW_pad,
        bytes_accessed=2 * N * C * HW_pad * itemsize + N * HW_pad * 4,
    )

    partials = pl.pallas_call(
        _make_kernel(eps),
        out_shape=jax.ShapeDtypeStruct((N, n_rows, 128), jnp.float32),
        grid_spec=pltpu.PrefetchScalarGridSpec(
            num_scalar_prefetch=0,
            grid=grid,
            in_specs=[
                pl.BlockSpec((bn, C, tile_s, 128), lambda n, j: (n, 0, j, 0)),
                pl.BlockSpec((bn, C, tile_s, 128), lambda n, j: (n, 0, j, 0)),
            ],
            out_specs=pl.BlockSpec((bn, tile_s, 128), lambda n, j: (n, j, 0)),
        ),
        compiler_params=pltpu.CompilerParams(
            dimension_semantics=("parallel", "parallel"),
            vmem_limit_bytes=vmem_limit_bytes,
        ),
        cost_estimate=cost,
    )(f1_r, f2_r)

    # Tiny final reduction (mask padded lanes) + mean in the wrapper.
    loss_map = partials.reshape(N, HW_pad)[:, :HW]
    return jnp.sum(loss_map) / jnp.float32(M)


def cosine_similarity_loss_ref(f1, f2, eps=1e-05):
    """Pure-JAX reference mirroring the PyTorch module."""
    f1xf2 = (f1 * f2).sum(axis=1)
    f1_ = jnp.sqrt(jnp.power(f1, 2).sum(axis=1))
    f2_ = jnp.sqrt(jnp.power(f2, 2).sum(axis=1))
    cosine = f1xf2 / (f1_ * f2_ + eps)
    return (1.0 - cosine).mean()


if __name__ == "__main__":
    key = jax.random.PRNGKey(0)
    k1, k2 = jax.random.split(key)

    N, C, H, W = 2, 4, 16, 16
    f1 = jax.random.normal(k1, (N, C, H, W), dtype=jnp.float32)
    f2 = jax.random.normal(k2, (N, C, H, W), dtype=jnp.float32)

    loss = jax.block_until_ready(cosine_similarity_loss(f1, f2))
    ref = jax.block_until_ready(cosine_similarity_loss_ref(f1, f2))

    assert jnp.allclose(loss, ref, rtol=1e-5, atol=1e-5), (loss, ref)
    print("KERNEL_OK")
</pallas_src>

<mosaic_0001>
module attributes {stable_mosaic.version = 11 : i64} {
  func.func @kernel(%arg0: i32, %arg1: i32, %arg2: memref<2x4x2x128xf32, #tpu.memory_space<vmem>>, %arg3: memref<2x4x2x128xf32, #tpu.memory_space<vmem>>, %arg4: memref<2x2x128xf32, #tpu.memory_space<vmem>>) attributes {dimension_semantics = [#tpu.dimension_semantics<parallel>, #tpu.dimension_semantics<parallel>], iteration_bounds = array<i64: 1, 1>, scalar_prefetch = 0 : i64, scratch_operands = 0 : i64, tpu.core_type = #tpu.core_type<tc>, window_params = [{transform_indices = @transform_0, window_bounds = array<i64: 2, 4, 2, 128>}, {transform_indices = @transform_1, window_bounds = array<i64: 2, 4, 2, 128>}, {transform_indices = @transform_2, window_bounds = array<i64: 2, 2, 128>}]} {
    %c0 = arith.constant 0 : index
    %c0_0 = arith.constant 0 : index
    %c0_1 = arith.constant 0 : index
    %c0_2 = arith.constant 0 : index
    %0 = vector.load %arg2[%c0, %c0_0, %c0_1, %c0_2] : memref<2x4x2x128xf32, #tpu.memory_space<vmem>>, vector<2x4x2x128xf32>
    %c0_3 = arith.constant 0 : index
    %c0_4 = arith.constant 0 : index
    %c0_5 = arith.constant 0 : index
    %c0_6 = arith.constant 0 : index
    %1 = vector.load %arg3[%c0_3, %c0_4, %c0_5, %c0_6] : memref<2x4x2x128xf32, #tpu.memory_space<vmem>>, vector<2x4x2x128xf32>
    %2 = arith.mulf %0, %1 : vector<2x4x2x128xf32>
    %cst = arith.constant dense<0.000000e+00> : vector<2x2x128xf32>
    %3 = vector.multi_reduction <add>, %2, %cst [1] : vector<2x4x2x128xf32> to vector<2x2x128xf32>
    %4 = arith.mulf %0, %0 : vector<2x4x2x128xf32>
    %cst_7 = arith.constant dense<0.000000e+00> : vector<2x2x128xf32>
    %5 = vector.multi_reduction <add>, %4, %cst_7 [1] : vector<2x4x2x128xf32> to vector<2x2x128xf32>
    %6 = arith.mulf %1, %1 : vector<2x4x2x128xf32>
    %cst_8 = arith.constant dense<0.000000e+00> : vector<2x2x128xf32>
    %7 = vector.multi_reduction <add>, %6, %cst_8 [1] : vector<2x4x2x128xf32> to vector<2x2x128xf32>
    %8 = arith.mulf %5, %7 : vector<2x2x128xf32>
    %9 = math.sqrt %8 : vector<2x2x128xf32>
    %cst_9 = arith.constant 9.99999974E-6 : f32
    %10 = vector.broadcast %cst_9 : f32 to vector<2x2x128xf32>
    %11 = arith.addf %9, %10 : vector<2x2x128xf32>
    %12 = tpu.reciprocal %11 : vector<2x2x128xf32> -> vector<2x2x128xf32>
    %13 = arith.mulf %3, %12 : vector<2x2x128xf32>
    %cst_10 = arith.constant 1.000000e+00 : f32
    %14 = vector.broadcast %cst_10 : f32 to vector<2x2x128xf32>
    %15 = arith.subf %14, %13 : vector<2x2x128xf32>
    %c0_11 = arith.constant 0 : index
    %c0_12 = arith.constant 0 : index
    %c0_13 = arith.constant 0 : index
    %16 = vector.load %arg4[%c0_11, %c0_12, %c0_13] : memref<2x2x128xf32, #tpu.memory_space<vmem>>, vector<2x2x128xf32>
    tpu.vector_store %arg4[%c0_11, %c0_12, %c0_13], %15 {strides = array<i32>} : memref<2x2x128xf32, #tpu.memory_space<vmem>>, vector<2x2x128xf32>,
    return
  }
  func.func @transform_0(%arg0: i32, %arg1: i32) -> (i32, i32, i32, i32) {
    %c0_i32 = arith.constant 0 : i32
    %c0_i32_0 = arith.constant 0 : i32
    %c0_i32_1 = arith.constant 0 : i32
    return %arg0, %c0_i32, %arg1, %c0_i32_0 : i32, i32, i32, i32
  }
  func.func @transform_1(%arg0: i32, %arg1: i32) -> (i32, i32, i32, i32) {
    %c0_i32 = arith.constant 0 : i32
    %c0_i32_0 = arith.constant 0 : i32
    %c0_i32_1 = arith.constant 0 : i32
    return %arg0, %c0_i32, %arg1, %c0_i32_0 : i32, i32, i32, i32
  }
  func.func @transform_2(%arg0: i32, %arg1: i32) -> (i32, i32, i32) {
    %c0_i32 = arith.constant 0 : i32
    %c0_i32_0 = arith.constant 0 : i32
    return %arg0, %arg1, %c0_i32 : i32, i32, i32
  }
}

</mosaic_0001>

<bundles_post_ra>
// kernel: tpu_custom_call.1
= control target key start
LH: loop header
LB: loop body
LE: loop exit
PB: predicated region body
PF: predicated region fallthrough
CT: control target
= control target key end

     0   :  { %7 = vsyncpa [#allocation3], 0  ;;  %s363_s0 = inlined_call_operand.hbm [shape: f32[2,4,2,128], index: 0, kind: input, shape index: {}]   ;;  %s364_s1 = inlined_call_operand.hbm [shape: f32[2,4,2,128], index: 1, kind: input, shape index: {}]   ;;  %s365_s2 = inlined_call_operand.hbm [shape: f32[2,2,128], index: 2, kind: output, shape index: {}]  }
   0x1   :  { %8 = vsyncpa [#allocation6], 0 }
   0x2   :  { %9 = vsyncpa [#allocation4], 0  ;;  %s246_s9 = smov [#allocation2]  }
   0x3   :  { %s15_s10 = sshll.u32 %s246_s9, 4  ;;  %s16_s10 = int_to_ptr.vmem [resolvable:$true] %s15_s10 }
   0x4   :  { %s188_s11 = scalar_lea.vmem %s16_s10, 256  ;;  %p193_p1 = scmp.lt.s32.totalorder %s16_s10, %s16_s10 }
   0x5   :  { %p189_p0 = scmp.ne.s32.totalorder %s16_s10, %s188_s11  ;;  %p194_p2 = scmp.lt.s32.totalorder %s188_s11, %s188_s11 }
   0x7   :  { %p195_p3 = por %p194_p2, %p193_p1 }
   0x9   :  { %p196_p4 = pnand %p195_p3, %p189_p0 }
   0xb   :  { %199 = shalt.err (!%p196_p4)
}
   0xc   :  { %s247_s12 = smov 32   ;;  %s248_s13 = smov 2  }
   0xd   :  { %21 = dma.hbm_to_vmem [thread:$0]  %s363_s0, 256, %s16_s10, [#allocation3], %s247_s12, %s247_s12, %s248_s13  }
   0xe   :  { %s249_s16 = smov [#allocation5]  }
   0xf   :  { %s27_s17 = sshll.u32 %s249_s16, 4  ;;  %s28_s17 = int_to_ptr.vmem [resolvable:$true] %s27_s17 }
  0x10   :  { %s208_s18 = scalar_lea.vmem %s28_s17, 256  ;;  %p213_p6 = scmp.lt.s32.totalorder %s28_s17, %s28_s17 }
  0x11   :  { %p209_p5 = scmp.ne.s32.totalorder %s28_s17, %s208_s18  ;;  %p214_p7 = scmp.lt.s32.totalorder %s208_s18, %s208_s18 }
  0x13   :  { %p215_p8 = por %p214_p7, %p213_p6 }
  0x15   :  { %p216_p9 = pnand %p215_p8, %p209_p5 }
  0x17   :  { %219 = shalt.err (!%p216_p9)
}
  0x18   :  { %33 = dma.hbm_to_vmem [thread:$0]  %s364_s1, 256, %s28_s17, [#allocation6], %s247_s12, %s247_s12, %s248_s13  }
  0x19   :  { %240 = dma.done.wait [#allocation3], 256  }
  0x1a   :  { %241 = vsyncadd [#allocation3], 4294967040 }
  0x1b   :  { %242 = dma.done.wait [#allocation6], 256  }
  0x1c   :  { %243 = vsyncadd [#allocation6], 4294967040  ;;  %vm64_vm0 = vcmask 1041408   ;;  %v278_v0 = vld [vmem:[#allocation2] sm:$0x3]  ;;  %s250_s0 = smov [#allocation7]  }
  0x1d   :  { %v280_v1 = vld [vmem:[#allocation2 + $0x2] sm:$0x3]  ;;  %v282_v2 = vld [vmem:[#allocation2 + $0x4] sm:$0x3]  ;;  %v284_v3 = vld [vmem:[#allocation2 + $0x6] sm:$0x3]  ;;  %v79_v5 = vmul.f32 %v278_v0, %v278_v0 }
  0x1e   :  { %v286_v4 = vld [vmem:[#allocation5] sm:$0x3]  ;;  %v80_v6 = vmul.f32 %v280_v1, %v280_v1  ;;  %v81_v7 = vmul.f32 %v282_v2, %v282_v2  ;;  %v49_v8 = vld [vmem:[#allocation5 + $0x2] sm:$0x3]  ;;  %v294_v9 = vld [vmem:[#allocation5 + $0x4] sm:$0x3]  ;;  %v82_v14 = vmul.f32 %v284_v3, %v284_v3 }
  0x1f   :  { %v296_v10 = vld [vmem:[#allocation5 + $0x6] sm:$0x3]  ;;  %v87_v11 = vsel %vm64_vm0, %v79_v5, 0.0  ;;  %v101_v13 = vmul.f32 %v286_v4, %v286_v4  ;;  %v102_v17 = vmul.f32 %v49_v8, %v49_v8  ;;  %v103_v18 = vmul.f32 %v294_v9, %v294_v9  ;;  %v310_v22 = vld [vmem:[#allocation2 + $0x8] sm:$0x3]  ;;  %s154_s1 = sshll.u32 %s250_s0, 4  ;;  %s155_s1 = int_to_ptr.vmem [resolvable:$true] %s154_s1 }
  0x20   :  { %v88_v12 = vsel %vm64_vm0, %v80_v6, 0.0  ;;  %v90_v16 = vsel %vm64_vm0, %v81_v7, 0.0  ;;  %v104_v19 = vmul.f32 %v296_v10, %v296_v10  ;;  %v312_v23 = vld [vmem:[#allocation2 + $0xa] sm:$0x3]  ;;  %v92_v24 = vsel %vm64_vm0, %v82_v14, 0.0  ;;  %s220_s21 = scalar_lea.vmem %s155_s1, 64  ;;  %p225_p11 = scmp.lt.s32.totalorder %s155_s1, %s155_s1 }
  0x21   :  { %v89_v15 = vadd.f32 %v88_v12, %v87_v11  ;;  %v109_v21 = vsel %vm64_vm0, %v101_v13, 0.0  ;;  %v110_v25 = vsel %vm64_vm0, %v102_v17, 0.0  ;;  %v112_v26 = vsel %vm64_vm0, %v103_v18, 0.0  ;;  %v317_v28 = vld [vmem:[#allocation2 + $0xc] sm:$0x3]  ;;  %p221_p10 = scmp.ne.s32.totalorder %s155_s1, %s220_s21  ;;  %p226_p12 = scmp.lt.s32.totalorder %s220_s21, %s220_s21 }
  0x22   :  { %v111_v27 = vadd.f32 %v110_v25, %v109_v21  ;;  %v114_v29 = vsel %vm64_vm0, %v104_v19, 0.0  ;;  %v320_v30 = vld [vmem:[#allocation2 + $0xe] sm:$0x3]  ;;  %v52_v31 = vld [vmem:[#allocation5 + $0x8] sm:$0x3]  ;;  %v83_v32 = vmul.f32 %v310_v22, %v310_v22  ;;  %v84_v33 = vmul.f32 %v312_v23, %v312_v23 }
  0x23   :  { %v91_v20 = vadd.f32 %v90_v16, %v89_v15  ;;  %v53_v36 = vld [vmem:[#allocation5 + $0xa] sm:$0x3]  ;;  %v54_v37 = vld [vmem:[#allocation5 + $0xc] sm:$0x3]  ;;  %v55_v38 = vld [vmem:[#allocation5 + $0xe] sm:$0x3]  ;;  %v85_v39 = vmul.f32 %v317_v28, %v317_v28  ;;  %v86_v43 = vmul.f32 %v320_v30, %v320_v30  ;;  %v105_v45 = vmul.f32 %v52_v31, %v52_v31  ;;  %p227_p13 = por %p226_p12, %p225_p11 }
  0x24   :  { %v113_v35 = vadd.f32 %v112_v26, %v111_v27  ;;  %v94_v40 = vsel %vm64_vm0, %v83_v32, 0.0  ;;  %v95_v41 = vsel %vm64_vm0, %v84_v33, 0.0  ;;  %v106_v47 = vmul.f32 %v53_v36, %v53_v36 }
  0x25   :  { %v93_v34 = vadd.f32 %v92_v24, %v91_v20  ;;  %v96_v44 = vadd.f32 %v95_v41, %v94_v40  ;;  %v97_v46 = vsel %vm64_vm0, %v85_v39, 0.0  ;;  %v107_v48 = vmul.f32 %v54_v37, %v54_v37  ;;  %p228_p0 = pnand %p227_p13, %p221_p10 }
  0x26   :  { %v115_v42 = vadd.f32 %v114_v29, %v113_v35  ;;  %v108_v50 = vmul.f32 %v55_v38, %v55_v38  ;;  %v116_v52 = vsel %vm64_vm0, %v105_v45, 0.0  ;;  %v117_v53 = vsel %vm64_vm0, %v106_v47, 0.0 }
  0x27   :  { %v98_v51 = vadd.f32 %v97_v46, %v96_v44  ;;  %v99_v54 = vsel %vm64_vm0, %v86_v43, 0.0  ;;  %v119_v55 = vsel %vm64_vm0, %v107_v48, 0.0  ;;  %v118_v56 = vadd.f32 %v117_v53, %v116_v52 }
  0x28   :  { %v123_v49 = vmul.f32 %v115_v42, %v93_v34  ;;  %v121_v57 = vsel %vm64_vm0, %v108_v50, 0.0  ;;  %v56_v6 = vmul.f32 %v286_v4, %v278_v0  ;;  %v57_v7 = vmul.f32 %v49_v8, %v280_v1 }
  0x29   :  { %v100_v58 = vadd.f32 %v99_v54, %v98_v51  ;;  %v120_v59 = vadd.f32 %v119_v55, %v118_v56  ;;  %v58_v14 = vmul.f32 %v294_v9, %v282_v2  ;;  %v59_v0 = vmul.f32 %v296_v10, %v284_v3 }
  0x2a   :  { %172 = vrsqrt.f32 %v123_v49  ;;  %vm127_vm1 = vcmp.eq.f32.partialorder %v123_v49, inf  ;;  %v130_v63 = vand.u32 2147483648, %v123_v49  ;;  %vm129_vm2 = vcmp.eq.f32.partialorder %v123_v49, 0.0 }
  0x2b   :  { %v122_v60 = vadd.f32 %v121_v57, %v120_v59  ;;  %v65_v15 = vsel %vm64_vm0, %v56_v6, 0.0  ;;  %v66_v16 = vsel %vm64_vm0, %v57_v7, 0.0  ;;  %v68_v1 = vsel %vm64_vm0, %v58_v14, 0.0 }
  0x2c   :  { %v67_v18 = vadd.f32 %v66_v16, %v65_v15  ;;  %v60_v8 = vmul.f32 %v52_v31, %v310_v22  ;;  %v61_v2 = vmul.f32 %v53_v36, %v312_v23  ;;  %v70_v24 = vsel %vm64_vm0, %v59_v0, 0.0 }
  0x2d   :  { %v124_v61 = vmul.f32 %v122_v60, %v100_v58  ;;  %v62_v26 = vmul.f32 %v54_v37, %v317_v28  ;;  %v63_v32 = vmul.f32 %v55_v38, %v320_v30 }
  0x2e   :  { %v69_v20 = vadd.f32 %v68_v1, %v67_v18  ;;  %v72_v27 = vsel %vm64_vm0, %v60_v8, 0.0  ;;  %v73_v3 = vsel %vm64_vm0, %v61_v2, 0.0 }
  0x2f   :  { %174 = vrsqrt.f32 %v124_v61  ;;  %vm134_vm3 = vcmp.eq.f32.partialorder %v124_v61, inf  ;;  %v137_v19 = vand.u32 2147483648, %v124_v61  ;;  %vm136_vm4 = vcmp.eq.f32.partialorder %v124_v61, 0.0 }
  0x30   :  { %v71_v10 = vadd.f32 %v70_v24, %v69_v20  ;;  %v74_v29 = vadd.f32 %v73_v3, %v72_v27  ;;  %v75_v22 = vsel %vm64_vm0, %v62_v26, 0.0  ;;  %v77_v35 = vsel %vm64_vm0, %v63_v32, 0.0 }
  0x32   :  { %v76_v33 = vadd.f32 %v75_v22, %v74_v29 }
  0x34   :  { %v78_v36 = vadd.f32 %v77_v35, %v76_v33 }
  0x37   :  { %v173_v62 = vpop.eup %172 }
  0x38   :  { %v126_v5 = vmul.f32 %v173_v62, %v123_v49 }
  0x3a   :  { %v128_v11 = vsel %vm127_vm1, %v123_v49, %v126_v5 }
  0x3b   :  { %v131_v12 = vsel %vm129_vm2, %v130_v63, %v128_v11 }
  0x3c   :  { %v139_v13 = vadd.f32 1e-05, %v131_v12  ;;  %v175_v17 = vpop.eup %174 }
  0x3d   :  { %v133_v4 = vmul.f32 %v175_v17, %v124_v61 }
  0x3e   :  { %176 = vrcp.f32 %v139_v13 }
  0x3f   :  { %v135_v9 = vsel %vm134_vm3, %v124_v61, %v133_v4 }
  0x40   :  { %v138_v21 = vsel %vm136_vm4, %v137_v19, %v135_v9 }
  0x41   :  { %v140_v25 = vadd.f32 1e-05, %v138_v21 }
  0x43   :  { %178 = vrcp.f32 %v140_v25 }
  0x4b   :  { %v177_v23 = vpop.eup %176 }
  0x4c   :  { %v143_v31 = vmul.f32 %v177_v23, %v71_v10 }
  0x4e   :  { %v145_v34 = vsub.f32 1.0, %v143_v31 }
  0x50   :  { %147 = vst [vmem:[#allocation7] sm:$0x3] %v145_v34  ;;  %v179_v28 = vpop.eup %178 }
  0x51   :  { %v144_v37 = vmul.f32 %v179_v28, %v78_v36 }
  0x53   :  { %v146_v39 = vsub.f32 1.0, %v144_v37 }
  0x55   :  { %148 = vst [vmem:[#allocation7 + $0x2] sm:$0x3] %v146_v39 }
  0x56   :  { %231 = shalt.err (!%p228_p0)
}
  0x57   :  { %160 = dma.vmem_to_hbm [thread:$0]  %s155_s1, 64, %s365_s2, [#allocation4], %s247_s12, %s247_s12, %s248_s13  }
  0x58   :  { %244 = dma.done.wait [#allocation4], 64  }
  0x59   :  { %245 = vsyncadd [#allocation4], 4294967232 }
  0x5a   :  { %164 = vsyncpa [#allocation3], 1 }
  0x5b   :  { %165 = vsyncpa [#allocation6], 1 }
  0x5c   :  { %166 = vsyncpa [#allocation4], 1 }

</bundles_post_ra>
